<compile_context>
chip_gen: v6e
topology: v6e:2x2x1
jax: 0.10.0
libtpu: 0.0.40
codegen_flags: <defaults>
</compile_context>

<pallas_src>
import jax
import jax.numpy as jnp
from jax.experimental import pallas as pl
from jax.experimental.pallas import tpu as pltpu

LANE = 128
SUB = 16  # sublane granularity for bf16 activations (packed (16,128) tiles)


def _round_up(n, m):
    return (n + m - 1) // m * m


def _silu(z):
    # SiLU via tanh identity: z*sigmoid(z) = 0.5*z*(1 + tanh(z/2)).
    # One EUP op (tanh) + VPU FMAs; exact (no approx reciprocal).
    return 0.5 * z * (1.0 + jnp.tanh(0.5 * z))


def _make_kernel(n_mid):
    """Kernel: Linear(+folded norm)+SiLU -> n_mid x (Linear+SiLU) -> Linear(+folded beta)."""

    def kernel(x_ref, w0_ref, wm_ref, wl_ref, bfm_ref, bl_ref, o_ref):
        # First layer: normalization already folded into w0/b0 by the wrapper.
        z = jnp.dot(x_ref[...], w0_ref[...],
                    preferred_element_type=jnp.float32) + bfm_ref[0:1, :]
        h = _silu(z)

        # Middle d_ff -> d_ff layers (unrolled at trace time).
        for li in range(n_mid):
            z = jnp.dot(h.astype(jnp.bfloat16), wm_ref[li],
                        preferred_element_type=jnp.float32) + bfm_ref[li + 1:li + 2, :]
            h = _silu(z)

        # Final Linear (beta folded into wl/bl).  Store only the true output
        # lanes: o_ref block is (TB, out_dim), not the padded 128-lane slab.
        y = jnp.dot(h.astype(jnp.bfloat16), wl_ref[...],
                    preferred_element_type=jnp.float32) + bl_ref[...]
        o_ref[...] = y[:, :o_ref.shape[1]]

    return kernel


def rootfind_mlp_forward(x, params, input_min, input_max, *,
                         output_mapping=jnp.tanh, block_batch=2048):
    """params: dict with 'weights' [(in,out), ...], 'biases' [(out,), ...], 'beta' scalar."""
    weights = [jnp.asarray(w, jnp.float32) for w in params["weights"]]
    biases = [jnp.asarray(b, jnp.float32) for b in params["biases"]]
    beta = jnp.asarray(params["beta"], jnp.float32)
    n_mid = len(weights) - 2               # number of d_ff -> d_ff hidden layers

    # ---- glue: handle the 3-D input exactly like the PyTorch module ----
    if x.ndim == 3:
        B, C, S = x.shape
        x2 = x.reshape(B, C * S).astype(jnp.float32)          # == flatten(start_dim=1)
        xmin = jnp.repeat(input_min.astype(jnp.float32), S).reshape(1, C * S)
        xmax = jnp.repeat(input_max.astype(jnp.float32), S).reshape(1, C * S)
    else:
        B, D = x.shape
        x2 = x.astype(jnp.float32)
        xmin = input_min.reshape(1, D).astype(jnp.float32)
        xmax = input_max.reshape(1, D).astype(jnp.float32)
    d_in = x2.shape[1]

    # Fold  x_norm = x*scale + shift  into the first Linear (computed in f32).
    scale = 2.0 / (xmax - xmin)                                # (1, d_in)
    shift = -2.0 * xmin / (xmax - xmin) - 1.0                  # (1, d_in)
    w0_f32 = scale.reshape(d_in, 1) * weights[0]               # (d_in, d_ff)
    b0_f32 = (shift @ weights[0]).reshape(-1) + biases[0]      # (d_ff,)

    d_ff = weights[0].shape[1]
    out_dim = weights[-1].shape[1]
    DP = _round_up(d_ff, LANE)        # padded hidden width (lane-aligned MXU N/K)
    OP = _round_up(out_dim, LANE)     # padded last-layer N (for the MXU only)

    # Fold beta into the final Linear; output_mapping is applied in the wrapper.
    w_last = weights[-1] * beta
    b_last = biases[-1] * beta

    def pad2(a, rows, cols):
        return jnp.pad(a, ((0, rows - a.shape[0]), (0, cols - a.shape[1])))

    # Zero-padding is exact: SiLU(0)=0 and padded weight rows/cols contribute 0.
    w0 = pad2(w0_f32, d_in, DP).astype(jnp.bfloat16)                       # (d_in, DP)
    if n_mid > 0:
        wm = jnp.stack([pad2(w, DP, DP) for w in weights[1:-1]]).astype(jnp.bfloat16)
    else:
        wm = jnp.zeros((1, DP, DP), jnp.bfloat16)                          # unused dummy
    wl = pad2(w_last, DP, OP).astype(jnp.bfloat16)                         # (DP, OP)

    bfm = jnp.stack(
        [jnp.pad(b0_f32 if i == 0 else biases[i], (0, DP - d_ff))
         for i in range(len(biases) - 1)])                                 # (1+n_mid, DP) f32
    bl = jnp.pad(b_last, (0, OP - out_dim)).reshape(1, OP)                 # (1, OP)      f32

    # ---- batch tile size ----
    # Keep double-buffered bf16 x tiles (2*TB*d_in*2 B) comfortably under the
    # 16 MiB v5e scoped VMEM default (also safe on v7x's 64 MiB) even for wide
    # d_in (3-D big C*S case); otherwise use big tiles to amortize per-step
    # overhead (~0.35 us).
    x_budget = 6 * 1024 * 1024
    tb_cap = max(SUB, (x_budget // (4 * d_in)) // SUB * SUB)
    TB = max(SUB, min(block_batch, _round_up(B, SUB), tb_cap))
    B_pad = _round_up(B, TB)
    # Guarantee >= 2 grid steps when worthwhile so the "parallel" batch axis can
    # shard across v7x's two TensorCores (neutral on single-TC v5e/v6e).
    if B_pad // TB == 1 and TB >= 2 * SUB:
        TB = max(SUB, _round_up(-(-B_pad // 2), SUB))
        B_pad = _round_up(B, TB)
    grid = (B_pad // TB,)

    # x streams as bf16 (half the HBM read); padded rows are zeros and sliced off.
    x_bf16 = x2.astype(jnp.bfloat16)
    if B_pad != B:
        x_bf16 = jnp.pad(x_bf16, ((0, B_pad - B), (0, 0)))

    fn = pl.pallas_call(
        _make_kernel(n_mid),
        out_shape=jax.ShapeDtypeStruct((B_pad, out_dim), jnp.float32),
        grid=grid,
        in_specs=[
            pl.BlockSpec((TB, d_in), lambda i: (i, 0)),      # x        (tiled over batch)
            pl.BlockSpec((d_in, DP), lambda i: (0, 0)),      # W0       (resident, norm folded)
            pl.BlockSpec(wm.shape, lambda i: (0, 0, 0)),     # mid Ws   (resident, stacked)
            pl.BlockSpec((DP, OP), lambda i: (0, 0)),        # W_last   (resident, beta folded)
            pl.BlockSpec(bfm.shape, lambda i: (0, 0)),       # biases   (resident, stacked)
            pl.BlockSpec((1, OP), lambda i: (0, 0)),         # b_last   (resident)
        ],
        out_specs=pl.BlockSpec((TB, out_dim), lambda i: (i, 0)),  # true-width output block
        compiler_params=pltpu.CompilerParams(
            dimension_semantics=("parallel",),               # megacore-shard the batch axis
        ),
    )
    out = fn(x_bf16, w0, wm, wl, bfm, bl)
    # output_mapping (user callable in the PyTorch module) applied here; padded
    # rows are sliced off first.
    return output_mapping(out[:B])


def _reference_forward(x, params, input_min, input_max):
    """Pure-JAX f32 reference matching the PyTorch forward (output_mapping = tanh)."""
    if x.ndim == 3:
        xn = (2.0 * (x - input_min[None, :, None])
              / (input_max[None, :, None] - input_min[None, :, None]) - 1.0)
        h = xn.reshape(x.shape[0], -1)
    else:
        h = 2.0 * (x - input_min[None, :]) / (input_max[None, :] - input_min[None, :]) - 1.0
    ws, bs = params["weights"], params["biases"]
    for w, b in zip(ws[:-1], bs[:-1]):
        h = jax.nn.silu(h @ w + b)
    y = h @ ws[-1] + bs[-1]
    return jnp.tanh(params["beta"] * y)


def init_params(key, input_dim, output_dim, d_ff=32, depth=2):
    dims = [input_dim] + [d_ff] * (depth + 1) + [output_dim]
    weights, biases = [], []
    for i in range(len(dims) - 1):
        key, kw, kb = jax.random.split(key, 3)
        fan_in = dims[i]
        w = jax.random.normal(kw, (dims[i], dims[i + 1]), jnp.float32) * (1.0 / jnp.sqrt(fan_in))
        b = jax.random.normal(kb, (dims[i + 1],), jnp.float32) * 0.01
        weights.append(w)
        biases.append(b)
    return {"weights": weights, "biases": biases, "beta": jnp.float32(1.0)}


if __name__ == "__main__":
    key = jax.random.PRNGKey(0)
    batch, input_dim, output_dim, d_ff, depth, seq = 8, 4, 2, 32, 2, 8

    k_p2, k_p3, k_x2, k_x3 = jax.random.split(key, 4)

    # ---- 2-D input case: (batch, input_dim) ----
    params2d = init_params(k_p2, input_dim, output_dim, d_ff=d_ff, depth=depth)
    in_min2d = jnp.full((input_dim,), -2.0, jnp.float32)
    in_max2d = jnp.full((input_dim,), 3.0, jnp.float32)
    x2d = jax.random.uniform(k_x2, (batch, input_dim), jnp.float32, minval=-2.0, maxval=3.0)

    out2d = jax.block_until_ready(rootfind_mlp_forward(x2d, params2d, in_min2d, in_max2d))
    ref2d = _reference_forward(x2d, params2d, in_min2d, in_max2d)
    assert out2d.shape == (batch, output_dim)
    # bf16 MXU inputs/weights -> relaxed tolerance vs f32 reference.
    assert jnp.allclose(out2d, ref2d, atol=2e-2, rtol=2e-2), float(jnp.abs(out2d - ref2d).max())

    # ---- 3-D input case: (batch, channels, seq); first Linear sees channels*seq ----
    params3d = init_params(k_p3, input_dim * seq, output_dim, d_ff=d_ff, depth=depth)
    x3d = jax.random.uniform(k_x3, (batch, input_dim, seq), jnp.float32, minval=-2.0, maxval=3.0)

    out3d = jax.block_until_ready(rootfind_mlp_forward(x3d, params3d, in_min2d, in_max2d))
    ref3d = _reference_forward(x3d, params3d, in_min2d, in_max2d)
    assert out3d.shape == (batch, output_dim)
    assert jnp.allclose(out3d, ref3d, atol=2e-2, rtol=2e-2), float(jnp.abs(out3d - ref3d).max())

    print("KERNEL_OK")
</pallas_src>

<mosaic_0001>
module attributes {stable_mosaic.version = 11 : i64} {
  func.func @kernel(%arg0: i32, %arg1: memref<16x4xbf16, #tpu.memory_space<vmem>>, %arg2: memref<4x128xbf16, #tpu.memory_space<vmem>>, %arg3: memref<2x128x128xbf16, #tpu.memory_space<vmem>>, %arg4: memref<128x128xbf16, #tpu.memory_space<vmem>>, %arg5: memref<3x128xf32, #tpu.memory_space<vmem>>, %arg6: memref<1x128xf32, #tpu.memory_space<vmem>>, %arg7: memref<16x2xf32, #tpu.memory_space<vmem>>) attributes {dimension_semantics = [#tpu.dimension_semantics<parallel>], iteration_bounds = array<i64: 1>, scalar_prefetch = 0 : i64, scratch_operands = 0 : i64, tpu.core_type = #tpu.core_type<tc>, window_params = [{transform_indices = @transform_0, window_bounds = array<i64: 16, 4>}, {pipeline_mode = #tpu.pipeline_mode<synchronous>, transform_indices = @transform_1, window_bounds = array<i64: 4, 128>}, {pipeline_mode = #tpu.pipeline_mode<synchronous>, transform_indices = @transform_2, window_bounds = array<i64: 2, 128, 128>}, {pipeline_mode = #tpu.pipeline_mode<synchronous>, transform_indices = @transform_3, window_bounds = array<i64: 128, 128>}, {pipeline_mode = #tpu.pipeline_mode<synchronous>, transform_indices = @transform_4, window_bounds = array<i64: 3, 128>}, {pipeline_mode = #tpu.pipeline_mode<synchronous>, transform_indices = @transform_5, window_bounds = array<i64: 1, 128>}, {transform_indices = @transform_6, window_bounds = array<i64: 16, 2>}]} {
    %c0 = arith.constant 0 : index
    %c0_0 = arith.constant 0 : index
    %0 = vector.load %arg1[%c0, %c0_0] : memref<16x4xbf16, #tpu.memory_space<vmem>>, vector<16x4xbf16>
    %c0_1 = arith.constant 0 : index
    %c0_2 = arith.constant 0 : index
    %1 = vector.load %arg2[%c0_1, %c0_2] : memref<4x128xbf16, #tpu.memory_space<vmem>>, vector<4x128xbf16>
    %cst = arith.constant dense<0.000000e+00> : vector<16x128xf32>
    %2 = tpu.matmul %0, %1, %cst {dimension_numbers = #tpu.dot_dimension_numbers<[1], [0], [0], [1], [0, 0, 1, 1], [], []>} : vector<16x4xbf16>, vector<4x128xbf16>, vector<16x128xf32> -> vector<16x128xf32>
    %c0_3 = arith.constant 0 : index
    %c0_4 = arith.constant 0 : index
    %3 = vector.load %arg5[%c0_3, %c0_4] : memref<3x128xf32, #tpu.memory_space<vmem>>, vector<1x128xf32>
    %4 = vector.broadcast %3 : vector<1x128xf32> to vector<16x128xf32>
    %5 = arith.addf %2, %4 : vector<16x128xf32>
    %cst_5 = arith.constant 5.000000e-01 : f32
    %6 = vector.broadcast %cst_5 : f32 to vector<16x128xf32>
    %7 = arith.mulf %6, %5 : vector<16x128xf32>
    %cst_6 = arith.constant 5.000000e-01 : f32
    %8 = vector.broadcast %cst_6 : f32 to vector<16x128xf32>
    %9 = arith.mulf %8, %5 : vector<16x128xf32>
    %10 = math.tanh %9 : vector<16x128xf32>
    %cst_7 = arith.constant 1.000000e+00 : f32
    %11 = vector.broadcast %cst_7 : f32 to vector<16x128xf32>
    %12 = arith.addf %11, %10 : vector<16x128xf32>
    %13 = arith.mulf %7, %12 : vector<16x128xf32>
    %14 = arith.truncf %13 : vector<16x128xf32> to vector<16x128xbf16>
    %c0_8 = arith.constant 0 : index
    %c0_9 = arith.constant 0 : index
    %c0_10 = arith.constant 0 : index
    %15 = vector.load %arg3[%c0_8, %c0_9, %c0_10] : memref<2x128x128xbf16, #tpu.memory_space<vmem>>, vector<1x128x128xbf16>
    %16 = vector.shape_cast %15 : vector<1x128x128xbf16> to vector<128x128xbf16>
    %cst_11 = arith.constant dense<0.000000e+00> : vector<16x128xf32>
    %17 = tpu.matmul %14, %16, %cst_11 {dimension_numbers = #tpu.dot_dimension_numbers<[1], [0], [0], [1], [0, 0, 1, 1], [], []>} : vector<16x128xbf16>, vector<128x128xbf16>, vector<16x128xf32> -> vector<16x128xf32>
    %c1 = arith.constant 1 : index
    %c0_12 = arith.constant 0 : index
    %18 = vector.load %arg5[%c1, %c0_12] : memref<3x128xf32, #tpu.memory_space<vmem>>, vector<1x128xf32>
    %19 = vector.broadcast %18 : vector<1x128xf32> to vector<16x128xf32>
    %20 = arith.addf %17, %19 : vector<16x128xf32>
    %cst_13 = arith.constant 5.000000e-01 : f32
    %21 = vector.broadcast %cst_13 : f32 to vector<16x128xf32>
    %22 = arith.mulf %21, %20 : vector<16x128xf32>
    %cst_14 = arith.constant 5.000000e-01 : f32
    %23 = vector.broadcast %cst_14 : f32 to vector<16x128xf32>
    %24 = arith.mulf %23, %20 : vector<16x128xf32>
    %25 = math.tanh %24 : vector<16x128xf32>
    %cst_15 = arith.constant 1.000000e+00 : f32
    %26 = vector.broadcast %cst_15 : f32 to vector<16x128xf32>
    %27 = arith.addf %26, %25 : vector<16x128xf32>
    %28 = arith.mulf %22, %27 : vector<16x128xf32>
    %29 = arith.truncf %28 : vector<16x128xf32> to vector<16x128xbf16>
    %c1_16 = arith.constant 1 : index
    %c0_17 = arith.constant 0 : index
    %c0_18 = arith.constant 0 : index
    %30 = vector.load %arg3[%c1_16, %c0_17, %c0_18] : memref<2x128x128xbf16, #tpu.memory_space<vmem>>, vector<1x128x128xbf16>
    %31 = vector.shape_cast %30 : vector<1x128x128xbf16> to vector<128x128xbf16>
    %cst_19 = arith.constant dense<0.000000e+00> : vector<16x128xf32>
    %32 = tpu.matmul %29, %31, %cst_19 {dimension_numbers = #tpu.dot_dimension_numbers<[1], [0], [0], [1], [0, 0, 1, 1], [], []>} : vector<16x128xbf16>, vector<128x128xbf16>, vector<16x128xf32> -> vector<16x128xf32>
    %c2 = arith.constant 2 : index
    %c0_20 = arith.constant 0 : index
    %33 = vector.load %arg5[%c2, %c0_20] : memref<3x128xf32, #tpu.memory_space<vmem>>, vector<1x128xf32>
    %34 = vector.broadcast %33 : vector<1x128xf32> to vector<16x128xf32>
    %35 = arith.addf %32, %34 : vector<16x128xf32>
    %cst_21 = arith.constant 5.000000e-01 : f32
    %36 = vector.broadcast %cst_21 : f32 to vector<16x128xf32>
    %37 = arith.mulf %36, %35 : vector<16x128xf32>
    %cst_22 = arith.constant 5.000000e-01 : f32
    %38 = vector.broadcast %cst_22 : f32 to vector<16x128xf32>
    %39 = arith.mulf %38, %35 : vector<16x128xf32>
    %40 = math.tanh %39 : vector<16x128xf32>
    %cst_23 = arith.constant 1.000000e+00 : f32
    %41 = vector.broadcast %cst_23 : f32 to vector<16x128xf32>
    %42 = arith.addf %41, %40 : vector<16x128xf32>
    %43 = arith.mulf %37, %42 : vector<16x128xf32>
    %44 = arith.truncf %43 : vector<16x128xf32> to vector<16x128xbf16>
    %c0_24 = arith.constant 0 : index
    %c0_25 = arith.constant 0 : index
    %45 = vector.load %arg4[%c0_24, %c0_25] : memref<128x128xbf16, #tpu.memory_space<vmem>>, vector<128x128xbf16>
    %cst_26 = arith.constant dense<0.000000e+00> : vector<16x128xf32>
    %46 = tpu.matmul %44, %45, %cst_26 {dimension_numbers = #tpu.dot_dimension_numbers<[1], [0], [0], [1], [0, 0, 1, 1], [], []>} : vector<16x128xbf16>, vector<128x128xbf16>, vector<16x128xf32> -> vector<16x128xf32>
    %c0_27 = arith.constant 0 : index
    %c0_28 = arith.constant 0 : index
    %47 = vector.load %arg6[%c0_27, %c0_28] : memref<1x128xf32, #tpu.memory_space<vmem>>, vector<1x128xf32>
    %48 = vector.broadcast %47 : vector<1x128xf32> to vector<16x128xf32>
    %49 = arith.addf %46, %48 : vector<16x128xf32>
    %50 = vector.extract_strided_slice %49 {offsets = [0, 0], sizes = [16, 2], strides = [1, 1]} : vector<16x128xf32> to vector<16x2xf32>
    %c0_29 = arith.constant 0 : index
    %c0_30 = arith.constant 0 : index
    %51 = vector.load %arg7[%c0_29, %c0_30] : memref<16x2xf32, #tpu.memory_space<vmem>>, vector<16x2xf32>
    tpu.vector_store %arg7[%c0_29, %c0_30], %50 {strides = array<i32>} : memref<16x2xf32, #tpu.memory_space<vmem>>, vector<16x2xf32>,
    return
  }
  func.func @transform_0(%arg0: i32) -> (i32, i32) {
    %c0_i32 = arith.constant 0 : i32
    %c0_i32_0 = arith.constant 0 : i32
    return %arg0, %c0_i32 : i32, i32
  }
  func.func @transform_1(%arg0: i32) -> (i32, i32) {
    %c0_i32 = arith.constant 0 : i32
    %c0_i32_0 = arith.constant 0 : i32
    %c0_i32_1 = arith.constant 0 : i32
    return %c0_i32, %c0_i32_0 : i32, i32
  }
  func.func @transform_2(%arg0: i32) -> (i32, i32, i32) {
    %c0_i32 = arith.constant 0 : i32
    %c0_i32_0 = arith.constant 0 : i32
    %c0_i32_1 = arith.constant 0 : i32
    %c0_i32_2 = arith.constant 0 : i32
    return %c0_i32, %c0_i32_0, %c0_i32_1 : i32, i32, i32
  }
  func.func @transform_3(%arg0: i32) -> (i32, i32) {
    %c0_i32 = arith.constant 0 : i32
    %c0_i32_0 = arith.constant 0 : i32
    %c0_i32_1 = arith.constant 0 : i32
    return %c0_i32, %c0_i32_0 : i32, i32
  }
  func.func @transform_4(%arg0: i32) -> (i32, i32) {
    %c0_i32 = arith.constant 0 : i32
    %c0_i32_0 = arith.constant 0 : i32
    %c0_i32_1 = arith.constant 0 : i32
    return %c0_i32, %c0_i32_0 : i32, i32
  }
  func.func @transform_5(%arg0: i32) -> (i32, i32) {
    %c0_i32 = arith.constant 0 : i32
    %c0_i32_0 = arith.constant 0 : i32
    %c0_i32_1 = arith.constant 0 : i32
    return %c0_i32, %c0_i32_0 : i32, i32
  }
  func.func @transform_6(%arg0: i32) -> (i32, i32) {
    %c0_i32 = arith.constant 0 : i32
    %c0_i32_0 = arith.constant 0 : i32
    return %arg0, %c0_i32 : i32, i32
  }
}

</mosaic_0001>

<bundles_post_ra>
// kernel: tpu_custom_call.1
= control target key start
LH: loop header
LB: loop body
LE: loop exit
PB: predicated region body
PF: predicated region fallthrough
CT: control target
= control target key end

     0   :  { %11 = vsyncpa [#allocation3], 0  ;;  %s799_s0 = inlined_call_operand.vmem [shape: bf16[16,4], index: 0, kind: input, shape index: {}]   ;;  %s800_s1 = inlined_call_operand.vmem [shape: bf16[4,128], index: 1, kind: input, shape index: {}]   ;;  %s801_s2 = inlined_call_operand.hbm [shape: bf16[2,128,128], index: 2, kind: input, shape index: {}]   ;;  %s802_s3 = inlined_call_operand.hbm [shape: bf16[128,128], index: 3, kind: input, shape index: {}]   ;;  %s803_s4 = inlined_call_operand.vmem [shape: f32[3,128], index: 4, kind: input, shape index: {}]   ;;  %s804_s5 = inlined_call_operand.vmem [shape: f32[1,128], index: 5, kind: input, shape index: {}]   ;;  %s805_s6 = inlined_call_operand.vmem [shape: f32[16,2], index: 6, kind: output, shape index: {}]  }
   0x1   :  { %12 = vsyncpa [#allocation5], 0  ;;  %s695_s21 = smov [#allocation2]  }
   0x2   :  { %s22_s22 = sshll.u32 %s695_s21, 4  ;;  %s23_s22 = int_to_ptr.vmem [resolvable:$true] %s22_s22 }
   0x3   :  { %s659_s23 = scalar_lea.vmem %s23_s22, 2048  ;;  %p664_p1 = scmp.lt.s32.totalorder %s23_s22, %s23_s22 }
   0x4   :  { %p660_p0 = scmp.ne.s32.totalorder %s23_s22, %s659_s23  ;;  %p665_p2 = scmp.lt.s32.totalorder %s659_s23, %s659_s23 }
   0x6   :  { %p666_p3 = por %p665_p2, %p664_p1 }
   0x8   :  { %p667_p4 = pnand %p666_p3, %p660_p0 }
   0xa   :  { %670 = shalt.err (!%p667_p4)
}
   0xb   :  { %s696_s24 = smov 64   ;;  %s697_s25 = smov 4  }
   0xc   :  { %28 = dma.hbm_to_vmem [thread:$0]  %s801_s2, 2048, %s23_s22, [#allocation3], %s696_s24, %s696_s24, %s697_s25  }
   0xd   :  { %s698_s28 = smov [#allocation4]  }
   0xe   :  { %s34_s29 = sshll.u32 %s698_s28, 4  ;;  %s35_s29 = int_to_ptr.vmem [resolvable:$true] %s34_s29 }
   0xf   :  { %s679_s30 = scalar_lea.vmem %s35_s29, 1024  ;;  %p684_p6 = scmp.lt.s32.totalorder %s35_s29, %s35_s29 }
  0x10   :  { %p680_p5 = scmp.ne.s32.totalorder %s35_s29, %s679_s30  ;;  %p685_p7 = scmp.lt.s32.totalorder %s679_s30, %s679_s30 }
  0x12   :  { %p686_p8 = por %p685_p7, %p684_p6 }
  0x14   :  { %p687_p9 = pnand %p686_p8, %p680_p5 }
  0x16   :  { %690 = shalt.err (!%p687_p9)
}
  0x17   :  { %40 = dma.hbm_to_vmem [thread:$0]  %s802_s3, 1024, %s35_s29, [#allocation5], %s696_s24, %s696_s24, %s697_s25  }
  0x18   :  { %691 = dma.done.wait [#allocation3], 2048  }
  0x19   :  { %692 = vsyncadd [#allocation3], 4294965248 }
  0x1a   :  { %693 = dma.done.wait [#allocation5], 1024  }
  0x1b   :  { %694 = vsyncadd [#allocation5], 4294966272  ;;  %v699_v0 = vmov 0.0   ;;  %vm700_vm0 = vmmov 0   ;;  %vm69_vm1 = vcmask 1041408   ;;  %v614_v3 = vld [vmem:[%s799_s0] sm:$0xff]  }
  0x1c   :  { %542 = vmatprep.subr.bf16.mxu0 %v699_v0  ;;  %544 = vmatprep.mubr.msk.bf16.mxu0 %vm700_vm0, %v699_v0  ;;  %v54_v1 = vld [vmem:[%s800_s1] sm:$0x3]  ;;  %vm65_vm2 = vcmask 31744   ;;  %v615_v4 = vld [vmem:[#allocation2 + $0x38] sm:$0xff]   ;;  %v616_v5 = vld [vmem:[#allocation2 + $0x30] sm:$0xff]   ;;  %vm474_vm3 = vcmask 15360  }
  0x1d   :  { %548 = vmatprep.subr.bf16.mxu1 %v699_v0  ;;  %564 = vmatprep.mubr.msk.bf16.mxu1 %vm700_vm0, %v699_v0  ;;  %v71_v2 = vsel %vm69_vm1, %v54_v1, 0  ;;  %v617_v6 = vld [vmem:[#allocation2 + $0x28] sm:$0xff]   ;;  %v618_v7 = vld [vmem:[#allocation2 + $0x20] sm:$0xff]   ;;  %v619_v8 = vld [vmem:[#allocation2 + $0x18] sm:$0xff]  }
  0x1e   :  { %543 = vmatpush3.bf16.msra.mxu0 %v71_v2  ;;  %549 = vmatpush3.bf16.msra.mxu1 %v615_v4  ;;  %v620_v9 = vld [vmem:[#allocation2 + $0x10] sm:$0xff]   ;;  %v621_v10 = vld [vmem:[#allocation2 + $0x8] sm:$0xff]   ;;  %v622_v11 = vld [vmem:[#allocation2] sm:$0xff]  }
  0x1f   :  { %568 = vmatprep.subr.bf16.mxu0 %v699_v0  ;;  %550 = vmatprep.subr.bf16.mxu1 %v699_v0  ;;  %v623_v12 = vld [vmem:[#allocation2 + $0x78] sm:$0xff]   ;;  %v483_v13 = vld [vmem:[%s803_s4] ss:$0 sm:$0xff]  ;;  %v624_v29 = vld [vmem:[#allocation2 + $0x70] sm:$0xff]  }
  0x20   :  { %v625_v30 = vld [vmem:[#allocation2 + $0x68] sm:$0xff]   ;;  %v626_v31 = vld [vmem:[#allocation2 + $0x60] sm:$0xff]   ;;  %v627_v32 = vld [vmem:[#allocation2 + $0x58] sm:$0xff]  }
  0x21   :  { %545 = vmatmul.mubr.msk.bf16.vlgmr.msra.gmra.mxu0 %vm65_vm2, %v614_v3  ;;  %v628_v33 = vld [vmem:[#allocation2 + $0x50] sm:$0xff]   ;;  %v629_v34 = vld [vmem:[#allocation2 + $0x48] sm:$0xff]   ;;  %v630_v35 = vld [vmem:[#allocation2 + $0x40] sm:$0xff]  }
  0x22   :  { %584 = vmatprep.mubr.msk.bf16.mxu0 %vm700_vm0, %v699_v0  ;;  %551 = vmatpush3.bf16.msra.mxu1 %v616_v5  ;;  %v631_v36 = vld [vmem:[#allocation4 + $0x38] sm:$0xff]   ;;  %v486_v37 = vld [vmem:[%s803_s4 + $0x1] ss:$0 sm:$0xff]  ;;  %v632_v53 = vld [vmem:[#allocation4 + $0x30] sm:$0xff]  }
  0x23   :  { %552 = vmatprep.subr.bf16.mxu1 %v699_v0  ;;  %569 = vmatpush3.bf16.msra.mxu0 %v623_v12  ;;  %v633_v54 = vld [vmem:[#allocation4 + $0x28] sm:$0xff]   ;;  %v634_v55 = vld [vmem:[#allocation4 + $0x20] sm:$0xff]   ;;  %v635_v56 = vld [vmem:[#allocation4 + $0x18] sm:$0xff]  }
  0x24   :  { %570 = vmatprep.subr.bf16.mxu0 %v699_v0  ;;  %v636_v57 = vld [vmem:[#allocation4 + $0x10] sm:$0xff]   ;;  %v637_v58 = vld [vmem:[#allocation4 + $0x8] sm:$0xff]   ;;  %v638_v59 = vld [vmem:[#allocation4] sm:$0xff]  }
  0x25   :  { %v495_v60 = vld [vmem:[%s803_s4 + $0x2] ss:$0 sm:$0xff]  ;;  %v504_v12 = vld [vmem:[%s804_s5] ss:$0 sm:$0xff] }
  0x26   :  { %553 = vmatpush3.bf16.msra.mxu1 %v617_v6 }
  0x27   :  { %554 = vmatprep.subr.bf16.mxu1 %v699_v0  ;;  %571 = vmatpush3.bf16.msra.mxu0 %v624_v29 }
  0x28   :  { %572 = vmatprep.subr.bf16.mxu0 %v699_v0 }
  0x2a   :  { %555 = vmatpush3.bf16.msra.mxu1 %v618_v7 }
  0x2b   :  { %556 = vmatprep.subr.bf16.mxu1 %v699_v0  ;;  %573 = vmatpush3.bf16.msra.mxu0 %v625_v30 }
  0x2c   :  { %574 = vmatprep.subr.bf16.mxu0 %v699_v0 }
  0x2e   :  { %557 = vmatpush3.bf16.msra.mxu1 %v619_v8 }
  0x2f   :  { %558 = vmatprep.subr.bf16.mxu1 %v699_v0  ;;  %575 = vmatpush3.bf16.msra.mxu0 %v626_v31 }
  0x30   :  { %576 = vmatprep.subr.bf16.mxu0 %v699_v0 }
  0x32   :  { %559 = vmatpush3.bf16.msra.mxu1 %v620_v9 }
  0x33   :  { %560 = vmatprep.subr.bf16.mxu1 %v699_v0  ;;  %577 = vmatpush3.bf16.msra.mxu0 %v627_v32 }
  0x34   :  { %578 = vmatprep.subr.bf16.mxu0 %v699_v0 }
  0x36   :  { %561 = vmatpush3.bf16.msra.mxu1 %v621_v10 }
  0x37   :  { %562 = vmatprep.subr.bf16.mxu1 %v699_v0  ;;  %579 = vmatpush3.bf16.msra.mxu0 %v628_v33 }
  0x38   :  { %580 = vmatprep.subr.bf16.mxu0 %v699_v0 }
  0x3a   :  { %563 = vmatpush3.bf16.msra.mxu1 %v622_v11 }
  0x3b   :  { %588 = vmatprep.subr.bf16.mxu1 %v699_v0  ;;  %581 = vmatpush3.bf16.msra.mxu0 %v629_v34 }
  0x3c   :  { %582 = vmatprep.subr.bf16.mxu0 %v699_v0 }
  0x3f   :  { %583 = vmatpush3.bf16.msra.mxu0 %v630_v35 }
  0xe1   :  { %v107_v14 = vpop.f32.mrf.mxu0 }
  0xe2   :  { %v108_v15 = vadd.f32 %v483_v13, %v107_v14 }
  0xe3   :  { %v546_v16 = vpop.f32.mrf.mxu0 }
  0xe4   :  { %v114_v17 = vmul.f32 0.5, %v108_v15 }
  0xe5   :  { %v110_v18 = vpop.f32.mrf.mxu0 }
  0xe6   :  { %639 = vtanh.f32 %v114_v17  ;;  %v111_v19 = vadd.f32 %v483_v13, %v110_v18 }
  0xe7   :  { %v547_v20 = vpop.f32.mrf.mxu0 }
  0xe8   :  { %v115_v21 = vmul.f32 0.5, %v111_v19 }
  0xea   :  { %641 = vtanh.f32 %v115_v21 }
  0xf3   :  { %v640_v22 = vpop.eup %639 }
  0xf4   :  { %v118_v23 = vadd.f32 1.0, %v640_v22 }
  0xf6   :  { %v120_v26 = vmul.f32 %v118_v23, %v114_v17 }
  0xf7   :  { %v642_v24 = vpop.eup %641 }
  0xf8   :  { %v119_v25 = vadd.f32 1.0, %v642_v24 }
  0xfa   :  { %v121_v27 = vmul.f32 %v119_v25, %v115_v21 }
  0xfc   :  { %v122_v28 = vpack.c.bf16 %v121_v27, %v120_v26 }
  0xfe   :  { %565 = vmatmul.mubr.bf16.vlgmr.msra.gmra.mxu1 %v122_v28 }
  0xff   :  { %604 = vmatprep.mubr.msk.bf16.mxu1 %vm700_vm0, %v699_v0  ;;  %589 = vmatpush3.bf16.msra.mxu1 %v631_v36 }
 0x100   :  { %590 = vmatprep.subr.bf16.mxu1 %v699_v0 }
 0x103   :  { %591 = vmatpush3.bf16.msra.mxu1 %v632_v53 }
 0x104   :  { %592 = vmatprep.subr.bf16.mxu1 %v699_v0 }
 0x107   :  { %593 = vmatpush3.bf16.msra.mxu1 %v633_v54 }
 0x108   :  { %594 = vmatprep.subr.bf16.mxu1 %v699_v0 }
 0x10b   :  { %595 = vmatpush3.bf16.msra.mxu1 %v634_v55 }
 0x10c   :  { %596 = vmatprep.subr.bf16.mxu1 %v699_v0 }
 0x10f   :  { %597 = vmatpush3.bf16.msra.mxu1 %v635_v56 }
 0x110   :  { %598 = vmatprep.subr.bf16.mxu1 %v699_v0 }
 0x113   :  { %599 = vmatpush3.bf16.msra.mxu1 %v636_v57 }
 0x114   :  { %600 = vmatprep.subr.bf16.mxu1 %v699_v0 }
 0x117   :  { %601 = vmatpush3.bf16.msra.mxu1 %v637_v58 }
 0x118   :  { %602 = vmatprep.subr.bf16.mxu1 %v699_v0 }
 0x11b   :  { %603 = vmatpush3.bf16.msra.mxu1 %v638_v59 }
 0x1be   :  { %v226_v38 = vpop.f32.mrf.mxu1 }
 0x1bf   :  { %v227_v39 = vadd.f32 %v486_v37, %v226_v38 }
 0x1c0   :  { %v566_v40 = vpop.f32.mrf.mxu1 }
 0x1c1   :  { %v233_v41 = vmul.f32 0.5, %v227_v39 }
 0x1c2   :  { %v229_v42 = vpop.f32.mrf.mxu1 }
 0x1c3   :  { %643 = vtanh.f32 %v233_v41  ;;  %v230_v43 = vadd.f32 %v486_v37, %v229_v42 }
 0x1c4   :  { %v567_v44 = vpop.f32.mrf.mxu1 }
 0x1c5   :  { %v234_v45 = vmul.f32 0.5, %v230_v43 }
 0x1c7   :  { %645 = vtanh.f32 %v234_v45 }
 0x1d0   :  { %v644_v46 = vpop.eup %643 }
 0x1d1   :  { %v237_v47 = vadd.f32 1.0, %v644_v46 }
 0x1d3   :  { %v239_v50 = vmul.f32 %v237_v47, %v233_v41 }
 0x1d4   :  { %v646_v48 = vpop.eup %645 }
 0x1d5   :  { %v238_v49 = vadd.f32 1.0, %v646_v48 }
 0x1d7   :  { %v240_v51 = vmul.f32 %v238_v49, %v234_v45 }
 0x1d9   :  { %v241_v52 = vpack.c.bf16 %v240_v51, %v239_v50 }
 0x1db   :  { %585 = vmatmul.mubr.bf16.vlgmr.msra.gmra.mxu0 %v241_v52 }
 0x29b   :  { %v346_v61 = vpop.f32.mrf.mxu0 }
 0x29c   :  { %v347_v62 = vadd.f32 %v495_v60, %v346_v61 }
 0x29d   :  { %v586_v63 = vpop.f32.mrf.mxu0 }
 0x29e   :  { %v353_v1 = vmul.f32 0.5, %v347_v62 }
 0x29f   :  { %v349_v2 = vpop.f32.mrf.mxu0 }
 0x2a0   :  { %647 = vtanh.f32 %v353_v1  ;;  %v350_v3 = vadd.f32 %v495_v60, %v349_v2 }
 0x2a1   :  { %v587_v4 = vpop.f32.mrf.mxu0 }
 0x2a2   :  { %v354_v5 = vmul.f32 0.5, %v350_v3 }
 0x2a4   :  { %649 = vtanh.f32 %v354_v5 }
 0x2ad   :  { %v648_v6 = vpop.eup %647 }
 0x2ae   :  { %v357_v7 = vadd.f32 1.0, %v648_v6 }
 0x2b0   :  { %v359_v9 = vmul.f32 %v357_v7, %v353_v1 }
 0x2b1   :  { %v650_v8 = vpop.eup %649 }
 0x2b2   :  { %v358_v0 = vadd.f32 1.0, %v650_v8 }
 0x2b4   :  { %v360_v10 = vmul.f32 %v358_v0, %v354_v5 }
 0x2b6   :  { %v361_v11 = vpack.c.bf16 %v360_v10, %v359_v9 }
 0x2b8   :  { %605 = vmatmul.mubr.bf16.vlgmr.msra.gmra.mxu1 %v361_v11 }
 0x378   :  { %v467_v13 = vpop.f32.mrf.mxu1 }
 0x379   :  { %v468_v14 = vadd.f32 %v504_v12, %v467_v13 }
 0x37a   :  { %v606_v15 = vpop.f32.mrf.mxu1 }
 0x37b   :  { %475 = vst.msk [vmem:[%s805_s6] sm:$0xff] %vm474_vm3, %v468_v14 }
 0x37c   :  { %v470_v16 = vpop.f32.mrf.mxu1 }
 0x37d   :  { %v471_v17 = vadd.f32 %v504_v12, %v470_v16 }
 0x37e   :  { %v607_v18 = vpop.f32.mrf.mxu1 }
 0x37f   :  { %476 = vst.msk [vmem:[%s805_s6 + $0x8] sm:$0xff] %vm474_vm3, %v471_v17 }
 0x380   :  { %481 = vsyncpa [#allocation3], 1 }
 0x381   :  { %482 = vsyncpa [#allocation5], 1 }

</bundles_post_ra>
